<compile_context>
chip_gen: v7x
topology: tpu7x:2x2x1
jax: 0.10.0
libtpu: 0.0.40
codegen_flags: <defaults>
</compile_context>

<pallas_src>
import jax
import jax.numpy as jnp
from jax.experimental import pallas as pl
from jax.experimental.pallas import tpu as pltpu

D_IN, D_HID, D_OUT = 128, 256, 768


def _mlp_kernel(x_ref, w1_ref, b1_ref, w2_ref, b2_ref, o_ref):
    # (TB,128)bf16 @ (128,256)bf16 -> f32 acc -> +b1 -> ReLU
    # -> cast bf16 -> @ (256,768)bf16 -> f32 acc -> +b2
    x = x_ref[...]
    h = jnp.dot(x, w1_ref[...], preferred_element_type=jnp.float32)
    h = jnp.maximum(h + b1_ref[...], 0.0)
    y = jnp.dot(h.astype(w2_ref.dtype), w2_ref[...],
                preferred_element_type=jnp.float32)
    o_ref[...] = (y + b2_ref[...]).astype(o_ref.dtype)


def _round_up(n, m):
    return (n + m - 1) // m * m


def audio_model_forward(x, w1, b1, w2, b2, *, block_b=512, out_dtype=jnp.float32):
    """Fused fc1 -> ReLU -> fc2.

    x:  (B, 128).  w1: (128, 256), b1: (256,), w2: (256, 768), b2: (768,).
    Weights are stored (in_features, out_features), i.e. PyTorch W.T, so the
    kernel computes x @ W1 + b1 -> ReLU -> @ W2 + b2.
    """
    B = x.shape[0]
    # Batch tile: multiple of 8 sublanes; as large as block_b allows (MXU M-dim fill).
    TB = min(block_b, _round_up(B, 8))
    B_pad = _round_up(B, TB)
    if B_pad != B:
        x = jnp.pad(x, ((0, B_pad - B), (0, 0)))

    # bf16 inputs/weights for full-rate MXU and halved weight/x DMA; f32 biases.
    x_b = x.astype(jnp.bfloat16)
    w1_b = w1.astype(jnp.bfloat16)
    w2_b = w2.astype(jnp.bfloat16)
    b1_2d = b1.reshape(1, D_HID).astype(jnp.float32)
    b2_2d = b2.reshape(1, D_OUT).astype(jnp.float32)

    grid = (B_pad // TB,)
    flops = 2 * B_pad * (D_IN * D_HID + D_HID * D_OUT)
    bytes_accessed = (
        B_pad * D_IN * 2                       # x (bf16)
        + D_IN * D_HID * 2 + D_HID * D_OUT * 2  # weights (bf16)
        + D_HID * 4 + D_OUT * 4                 # biases (f32)
        + B_pad * D_OUT * jnp.dtype(out_dtype).itemsize)  # output

    out = pl.pallas_call(
        _mlp_kernel,
        out_shape=jax.ShapeDtypeStruct((B_pad, D_OUT), out_dtype),
        grid_spec=pltpu.PrefetchScalarGridSpec(
            num_scalar_prefetch=0,
            grid=grid,
            in_specs=[
                pl.BlockSpec((TB, D_IN), lambda i: (i, 0)),      # x tile (pipelined)
                pl.BlockSpec((D_IN, D_HID), lambda i: (0, 0)),   # w1 (VMEM-resident)
                pl.BlockSpec((1, D_HID), lambda i: (0, 0)),      # b1 (VMEM-resident)
                pl.BlockSpec((D_HID, D_OUT), lambda i: (0, 0)),  # w2 (VMEM-resident)
                pl.BlockSpec((1, D_OUT), lambda i: (0, 0)),      # b2 (VMEM-resident)
            ],
            out_specs=pl.BlockSpec((TB, D_OUT), lambda i: (i, 0)),
        ),
        compiler_params=pltpu.CompilerParams(
            dimension_semantics=("parallel",)),  # lets v7x shard batch over both TCs
        cost_estimate=pl.CostEstimate(
            flops=flops, transcendentals=0, bytes_accessed=bytes_accessed),
    )(x_b, w1_b, b1_2d, w2_b, b2_2d)

    return out[:B]


def init_params(key):
    """Deterministic synthetic params matching nn.Linear(128,256), nn.Linear(256,768)."""
    k1, k2, k3, k4 = jax.random.split(key, 4)
    lim1 = 1.0 / jnp.sqrt(128.0)
    lim2 = 1.0 / jnp.sqrt(256.0)
    w1 = jax.random.uniform(k1, (D_IN, D_HID), jnp.float32, -lim1, lim1)
    b1 = jax.random.uniform(k2, (D_HID,), jnp.float32, -lim1, lim1)
    w2 = jax.random.uniform(k3, (D_HID, D_OUT), jnp.float32, -lim2, lim2)
    b2 = jax.random.uniform(k4, (D_OUT,), jnp.float32, -lim2, lim2)
    return w1, b1, w2, b2


if __name__ == "__main__":
    key = jax.random.PRNGKey(0)
    kx, kp = jax.random.split(key)
    w1, b1, w2, b2 = init_params(kp)

    def ref_fwd(xx):
        return jnp.maximum(xx @ w1 + b1, 0.0) @ w2 + b2

    # Case 1: small batch, single tile (TB snaps to round_up(B, 8)).
    B1 = 64
    x1 = jax.random.normal(kx, (B1, D_IN), jnp.float32)
    out1 = jax.block_until_ready(audio_model_forward(x1, w1, b1, w2, b2))
    assert out1.shape == (B1, D_OUT), out1.shape
    # bf16 weights/activations -> loosened tolerance vs f32 reference.
    assert jnp.allclose(out1, ref_fwd(x1), atol=5e-2, rtol=5e-2), "mismatch (case 1)"

    # Case 2: multi-step batch grid with a ragged final tile (exercises padding path).
    B2 = 50
    x2 = jax.random.normal(jax.random.fold_in(kx, 1), (B2, D_IN), jnp.float32)
    out2 = jax.block_until_ready(
        audio_model_forward(x2, w1, b1, w2, b2, block_b=16))
    assert out2.shape == (B2, D_OUT), out2.shape
    assert jnp.allclose(out2, ref_fwd(x2), atol=5e-2, rtol=5e-2), "mismatch (case 2)"

    print("KERNEL_OK")
</pallas_src>

<mosaic_0001>
module attributes {stable_mosaic.version = 11 : i64} {
  func.func @_mlp_kernel(%arg0: i32, %arg1: memref<64x128xbf16, #tpu.memory_space<vmem>>, %arg2: memref<128x256xbf16, #tpu.memory_space<vmem>>, %arg3: memref<1x256xf32, #tpu.memory_space<vmem>>, %arg4: memref<256x768xbf16, #tpu.memory_space<vmem>>, %arg5: memref<1x768xf32, #tpu.memory_space<vmem>>, %arg6: memref<64x768xf32, #tpu.memory_space<vmem>>) attributes {dimension_semantics = [#tpu.dimension_semantics<parallel>], iteration_bounds = array<i64: 1>, scalar_prefetch = 0 : i64, scratch_operands = 0 : i64, tpu.core_type = #tpu.core_type<tc>, window_params = [{transform_indices = @transform_0, window_bounds = array<i64: 64, 128>}, {pipeline_mode = #tpu.pipeline_mode<synchronous>, transform_indices = @transform_1, window_bounds = array<i64: 128, 256>}, {pipeline_mode = #tpu.pipeline_mode<synchronous>, transform_indices = @transform_2, window_bounds = array<i64: 1, 256>}, {pipeline_mode = #tpu.pipeline_mode<synchronous>, transform_indices = @transform_3, window_bounds = array<i64: 256, 768>}, {pipeline_mode = #tpu.pipeline_mode<synchronous>, transform_indices = @transform_4, window_bounds = array<i64: 1, 768>}, {transform_indices = @transform_5, window_bounds = array<i64: 64, 768>}]} {
    %c0 = arith.constant 0 : index
    %c0_0 = arith.constant 0 : index
    %0 = vector.load %arg1[%c0, %c0_0] : memref<64x128xbf16, #tpu.memory_space<vmem>>, vector<64x128xbf16>
    %c0_1 = arith.constant 0 : index
    %c0_2 = arith.constant 0 : index
    %1 = vector.load %arg2[%c0_1, %c0_2] : memref<128x256xbf16, #tpu.memory_space<vmem>>, vector<128x256xbf16>
    %cst = arith.constant dense<0.000000e+00> : vector<64x256xf32>
    %2 = tpu.matmul %0, %1, %cst {dimension_numbers = #tpu.dot_dimension_numbers<[1], [0], [0], [1], [0, 0, 1, 1], [], []>} : vector<64x128xbf16>, vector<128x256xbf16>, vector<64x256xf32> -> vector<64x256xf32>
    %c0_3 = arith.constant 0 : index
    %c0_4 = arith.constant 0 : index
    %3 = vector.load %arg3[%c0_3, %c0_4] : memref<1x256xf32, #tpu.memory_space<vmem>>, vector<1x256xf32>
    %4 = vector.broadcast %3 : vector<1x256xf32> to vector<64x256xf32>
    %5 = arith.addf %2, %4 : vector<64x256xf32>
    %cst_5 = arith.constant 0.000000e+00 : f32
    %6 = vector.broadcast %cst_5 : f32 to vector<64x256xf32>
    %7 = arith.maximumf %5, %6 : vector<64x256xf32>
    %8 = arith.truncf %7 : vector<64x256xf32> to vector<64x256xbf16>
    %c0_6 = arith.constant 0 : index
    %c0_7 = arith.constant 0 : index
    %9 = vector.load %arg4[%c0_6, %c0_7] : memref<256x768xbf16, #tpu.memory_space<vmem>>, vector<256x768xbf16>
    %cst_8 = arith.constant dense<0.000000e+00> : vector<64x768xf32>
    %10 = tpu.matmul %8, %9, %cst_8 {dimension_numbers = #tpu.dot_dimension_numbers<[1], [0], [0], [1], [0, 0, 1, 1], [], []>} : vector<64x256xbf16>, vector<256x768xbf16>, vector<64x768xf32> -> vector<64x768xf32>
    %c0_9 = arith.constant 0 : index
    %c0_10 = arith.constant 0 : index
    %11 = vector.load %arg5[%c0_9, %c0_10] : memref<1x768xf32, #tpu.memory_space<vmem>>, vector<1x768xf32>
    %12 = vector.broadcast %11 : vector<1x768xf32> to vector<64x768xf32>
    %13 = arith.addf %10, %12 : vector<64x768xf32>
    %c0_11 = arith.constant 0 : index
    %c0_12 = arith.constant 0 : index
    %14 = vector.load %arg6[%c0_11, %c0_12] : memref<64x768xf32, #tpu.memory_space<vmem>>, vector<64x768xf32>
    tpu.vector_store %arg6[%c0_11, %c0_12], %13 {strides = array<i32>} : memref<64x768xf32, #tpu.memory_space<vmem>>, vector<64x768xf32>,
    return
  }
  func.func @transform_0(%arg0: i32) -> (i32, i32) {
    %c0_i32 = arith.constant 0 : i32
    %c0_i32_0 = arith.constant 0 : i32
    return %arg0, %c0_i32 : i32, i32
  }
  func.func @transform_1(%arg0: i32) -> (i32, i32) {
    %c0_i32 = arith.constant 0 : i32
    %c0_i32_0 = arith.constant 0 : i32
    %c0_i32_1 = arith.constant 0 : i32
    return %c0_i32, %c0_i32_0 : i32, i32
  }
  func.func @transform_2(%arg0: i32) -> (i32, i32) {
    %c0_i32 = arith.constant 0 : i32
    %c0_i32_0 = arith.constant 0 : i32
    %c0_i32_1 = arith.constant 0 : i32
    return %c0_i32, %c0_i32_0 : i32, i32
  }
  func.func @transform_3(%arg0: i32) -> (i32, i32) {
    %c0_i32 = arith.constant 0 : i32
    %c0_i32_0 = arith.constant 0 : i32
    %c0_i32_1 = arith.constant 0 : i32
    return %c0_i32, %c0_i32_0 : i32, i32
  }
  func.func @transform_4(%arg0: i32) -> (i32, i32) {
    %c0_i32 = arith.constant 0 : i32
    %c0_i32_0 = arith.constant 0 : i32
    %c0_i32_1 = arith.constant 0 : i32
    return %c0_i32, %c0_i32_0 : i32, i32
  }
  func.func @transform_5(%arg0: i32) -> (i32, i32) {
    %c0_i32 = arith.constant 0 : i32
    %c0_i32_0 = arith.constant 0 : i32
    return %arg0, %c0_i32 : i32, i32
  }
}

</mosaic_0001>

<bundles_post_ra>
// kernel: tpu_custom_call.1
= control target key start
LH: loop header
LB: loop body
LE: loop exit
PB: predicated region body
PF: predicated region fallthrough
CT: control target
= control target key end

     0   :  { %10 = vsyncpa [#allocation3], 0  ;;  %s1803_s0 = inlined_call_operand.hbm [shape: bf16[64,128], index: 0, kind: input, shape index: {}]   ;;  %s1804_s1 = inlined_call_operand.hbm [shape: bf16[128,256], index: 1, kind: input, shape index: {}]   ;;  %s1805_s2 = inlined_call_operand.vmem [shape: f32[1,256], index: 2, kind: input, shape index: {}]   ;;  %s1806_s3 = inlined_call_operand.hbm [shape: bf16[256,768], index: 3, kind: input, shape index: {}]   ;;  %s1807_s4 = inlined_call_operand.vmem [shape: f32[1,768], index: 4, kind: input, shape index: {}]   ;;  %s1808_s5 = inlined_call_operand.hbm [shape: f32[64,768], index: 5, kind: output, shape index: {}]  }
   0x1   :  { %11 = vsyncpa [#allocation6], 0 }
   0x2   :  { %12 = vsyncpa [#allocation4], 0  ;;  %s1588_s18 = smov [#allocation5]   ;;  %s1494_s22 = scalar_lea.hbm %s1804_s1, 2048 }
   0x3   :  { %s30_s19 = sshll.u32 %s1588_s18, 4  ;;  %p1495_p0 = scmp.ne.s32.totalorder %s1804_s1, %s1494_s22  ;;  %s31_s19 = int_to_ptr.vmem [resolvable:$true] %s30_s19 }
   0x4   :  { %p1498_p1 = scmp.lt.u32.totalorder %s1494_s22, %s1804_s1 }
   0x6   :  { %p1500_p2 = pnand %p1498_p1, %p1495_p0 }
   0x8   :  { %1503 = shalt.err (!%p1500_p2)
}
   0x9   :  { %s1504_s27 = scalar_lea.vmem %s31_s19, 2048  ;;  %p1509_p4 = scmp.lt.s32.totalorder %s31_s19, %s31_s19 }
   0xa   :  { %p1505_p3 = scmp.ne.s32.totalorder %s31_s19, %s1504_s27  ;;  %p1510_p5 = scmp.lt.s32.totalorder %s1504_s27, %s1504_s27 }
   0xc   :  { %p1511_p6 = por %p1510_p5, %p1509_p4 }
   0xe   :  { %p1512_p7 = pnand %p1511_p6, %p1505_p3 }
  0x10   :  { %1515 = shalt.err (!%p1512_p7)
}
  0x11   :  { %s1589_s28 = smov 128   ;;  %s1590_s29 = smov 8  }
  0x12   :  { %36 = dma.hbm_to_vmem [thread:$0]  %s1804_s1, 2048, %s31_s19, [#allocation6], %s1589_s28, %s1589_s28, %s1590_s29  }
  0x13   :  { %s1591_s7 = smov [#allocation2]   ;;  %s1516_s11 = scalar_lea.hbm %s1803_s0, 512 }
  0x14   :  { %s18_s8 = sshll.u32 %s1591_s7, 4  ;;  %p1517_p8 = scmp.ne.s32.totalorder %s1803_s0, %s1516_s11  ;;  %s19_s8 = int_to_ptr.vmem [resolvable:$true] %s18_s8 }
  0x15   :  { %p1520_p9 = scmp.lt.u32.totalorder %s1516_s11, %s1803_s0 }
  0x17   :  { %p1522_p10 = pnand %p1520_p9, %p1517_p8 }
  0x19   :  { %1525 = shalt.err (!%p1522_p10)
}
  0x1a   :  { %s1526_s16 = scalar_lea.vmem %s19_s8, 512  ;;  %p1531_p12 = scmp.lt.s32.totalorder %s19_s8, %s19_s8 }
  0x1b   :  { %p1527_p11 = scmp.ne.s32.totalorder %s19_s8, %s1526_s16  ;;  %p1532_p13 = scmp.lt.s32.totalorder %s1526_s16, %s1526_s16 }
  0x1d   :  { %p1533_p0 = por %p1532_p13, %p1531_p12 }
  0x1f   :  { %p1534_p1 = pnand %p1533_p0, %p1527_p11 }
  0x21   :  { %1537 = shalt.err (!%p1534_p1)
}
  0x22   :  { %s1592_s1 = smov 64   ;;  %s1593_s17 = smov 4  }
  0x23   :  { %24 = dma.hbm_to_vmem [thread:$0]  %s1803_s0, 512, %s19_s8, [#allocation3], %s1592_s1, %s1592_s1, %s1593_s17  }
  0x24   :  { %s1594_s20 = smov [#allocation7]   ;;  %s1538_s24 = scalar_lea.hbm %s1806_s3, 12288 }
  0x25   :  { %s44_s21 = sshll.u32 %s1594_s20, 4  ;;  %p1539_p2 = scmp.ne.s32.totalorder %s1806_s3, %s1538_s24  ;;  %s45_s21 = int_to_ptr.vmem [resolvable:$true] %s44_s21 }
  0x26   :  { %p1542_p3 = scmp.lt.u32.totalorder %s1538_s24, %s1806_s3 }
  0x28   :  { %p1544_p4 = pnand %p1542_p3, %p1539_p2 }
  0x2a   :  { %1547 = shalt.err (!%p1544_p4)
}
  0x2b   :  { %s1548_s29 = scalar_lea.vmem %s45_s21, 12288  ;;  %p1553_p6 = scmp.lt.s32.totalorder %s45_s21, %s45_s21 }
  0x2c   :  { %p1549_p5 = scmp.ne.s32.totalorder %s45_s21, %s1548_s29  ;;  %p1554_p7 = scmp.lt.s32.totalorder %s1548_s29, %s1548_s29 }
  0x2e   :  { %p1555_p8 = por %p1554_p7, %p1553_p6 }
  0x30   :  { %p1556_p9 = pnand %p1555_p8, %p1549_p5 }
  0x32   :  { %1559 = shalt.err (!%p1556_p9)
}
  0x33   :  { %s1595_s0 = smov 384   ;;  %s1596_s30 = smov 24  }
  0x34   :  { %50 = dma.hbm_to_vmem [thread:$0]  %s1806_s3, 12288, %s45_s21, [#allocation6], %s1595_s0, %s1595_s0, %s1596_s30  }
  0x35   :  { %1582 = dma.done.wait [#allocation3], 512  }
  0x36   :  { %1583 = vsyncadd [#allocation3], 4294966784 }
  0x37   :  { %1584 = dma.done.wait [#allocation6], 14336  }
  0x38   :  { %1585 = vsyncadd [#allocation6], 4294952960  ;;  %v1597_v0 = vmov 0   ;;  %v1322_v1 = vld [vmem:[#allocation5 + $0x4] ss:$8 sps:$4 sm:$0xff]   ;;  %v1348_v45 = vld [vmem:[#allocation2 + $0x10] sm:$0xff]  }
  0x39   :  { %235 = vmatprep.mubr.bf16.mxu0 %v1597_v0  ;;  %v1324_v2 = vld [vmem:[#allocation5] ss:$8 sps:$4 sm:$0xff]   ;;  %203 = vmatprep.subr.bf16.mxu0 %v1322_v1  ;;  %v1325_v3 = vld [vmem:[#allocation5 + $0x14] ss:$8 sps:$4 sm:$0xff]   ;;  %v1327_v4 = vld [vmem:[#allocation5 + $0x10] ss:$8 sps:$4 sm:$0xff]  }
  0x3a   :  { %204 = vmatpush1.bf16.msra.mxu0 %v1324_v2  ;;  %v1328_v5 = vld [vmem:[#allocation5 + $0x24] ss:$8 sps:$4 sm:$0xff]   ;;  %v1330_v6 = vld [vmem:[#allocation5 + $0x20] ss:$8 sps:$4 sm:$0xff]   ;;  %v1331_v7 = vld [vmem:[#allocation5 + $0x34] ss:$8 sps:$4 sm:$0xff]  }
  0x3b   :  { %205 = vmatprep.subr.bf16.mxu0 %v1325_v3  ;;  %v1333_v8 = vld [vmem:[#allocation5 + $0x30] ss:$8 sps:$4 sm:$0xff]   ;;  %v1334_v9 = vld [vmem:[#allocation5 + $0x44] ss:$8 sps:$4 sm:$0xff]   ;;  %v1336_v10 = vld [vmem:[#allocation5 + $0x40] ss:$8 sps:$4 sm:$0xff]  }
  0x3c   :  { %v1350_v11 = vld [vmem:[#allocation7 + $0x4] ss:$24 sps:$4 sm:$0xff]   ;;  %v1352_v12 = vld [vmem:[#allocation7] ss:$24 sps:$4 sm:$0xff]   ;;  %v1356_v14 = vld [vmem:[#allocation7 + $0x34] ss:$24 sps:$4 sm:$0xff]  }
  0x3d   :  { %v1337_v13 = vld [vmem:[#allocation5 + $0x54] ss:$8 sps:$4 sm:$0xff]   ;;  %908 = vmatprep.subr.bf16.mxu1 %v1350_v11  ;;  %v1358_v15 = vld [vmem:[#allocation7 + $0x30] ss:$24 sps:$4 sm:$0xff]   ;;  %v1340_v17 = vld [vmem:[#allocation5 + $0x64] ss:$8 sps:$4 sm:$0xff]  }
  0x3e   :  { %206 = vmatpush1.bf16.msra.mxu0 %v1327_v4  ;;  %909 = vmatpush1.bf16.msra.mxu1 %v1352_v12  ;;  %v1339_v16 = vld [vmem:[#allocation5 + $0x50] ss:$8 sps:$4 sm:$0xff]   ;;  %v1362_v18 = vld [vmem:[#allocation7 + $0x64] ss:$24 sps:$4 sm:$0xff]   ;;  %v1342_v20 = vld [vmem:[#allocation5 + $0x60] ss:$8 sps:$4 sm:$0xff]  }
  0x3f   :  { %207 = vmatprep.subr.bf16.mxu0 %v1328_v5  ;;  %910 = vmatprep.subr.bf16.mxu1 %v1356_v14  ;;  %v1364_v19 = vld [vmem:[#allocation7 + $0x60] ss:$24 sps:$4 sm:$0xff]   ;;  %v1368_v21 = vld [vmem:[#allocation7 + $0x94] ss:$24 sps:$4 sm:$0xff]   ;;  %v1370_v23 = vld [vmem:[#allocation7 + $0x90] ss:$24 sps:$4 sm:$0xff]  }
  0x40   :  { %v1343_v22 = vld [vmem:[#allocation5 + $0x74] ss:$8 sps:$4 sm:$0xff]   ;;  %v1345_v24 = vld [vmem:[#allocation5 + $0x70] ss:$8 sps:$4 sm:$0xff]   ;;  %v1355_v26 = vld [vmem:[#allocation7 + $0xc] ss:$24 sps:$4 sm:$0xff]  }
  0x41   :  { %v1374_v25 = vld [vmem:[#allocation7 + $0xc4] ss:$24 sps:$4 sm:$0xff]   ;;  %v1376_v28 = vld [vmem:[#allocation7 + $0xc0] ss:$24 sps:$4 sm:$0xff]   ;;  %v1380_v31 = vld [vmem:[#allocation7 + $0xf4] ss:$24 sps:$4 sm:$0xff]  }
  0x42   :  { %208 = vmatpush1.bf16.msra.mxu0 %v1330_v6  ;;  %911 = vmatpush1.bf16.msra.mxu1 %v1358_v15  ;;  %v1346_v27 = vld [vmem:[#allocation2] sm:$0xff]   ;;  %v1361_v30 = vld [vmem:[#allocation7 + $0x3c] ss:$24 sps:$4 sm:$0xff]   ;;  %v1382_v32 = vld [vmem:[#allocation7 + $0xf0] ss:$24 sps:$4 sm:$0xff]  }
  0x43   :  { %209 = vmatprep.subr.bf16.mxu0 %v1331_v7  ;;  %912 = vmatprep.subr.bf16.mxu1 %v1362_v18  ;;  %v1353_v29 = vld [vmem:[#allocation7 + $0x8] ss:$24 sps:$4 sm:$0xff]   ;;  %v1359_v33 = vld [vmem:[#allocation7 + $0x38] ss:$24 sps:$4 sm:$0xff]   ;;  %v1386_v34 = vld [vmem:[#allocation7 + $0x124] ss:$24 sps:$4 sm:$0xff]  }
  0x44   :  { %v1367_v35 = vld [vmem:[#allocation7 + $0x6c] ss:$24 sps:$4 sm:$0xff]   ;;  %v1388_v37 = vld [vmem:[#allocation7 + $0x120] ss:$24 sps:$4 sm:$0xff]   ;;  %v1373_v39 = vld [vmem:[#allocation7 + $0x9c] ss:$24 sps:$4 sm:$0xff]  }
  0x45   :  { %v1347_v36 = vld [vmem:[#allocation2 + $0x8] sm:$0xff]   ;;  %v1371_v42 = vld [vmem:[#allocation7 + $0x98] ss:$24 sps:$4 sm:$0xff]   ;;  %v1398_v43 = vld [vmem:[#allocation7 + $0x184] ss:$24 sps:$4 sm:$0xff]  }
  0x46   :  { %210 = vmatpush1.bf16.msra.mxu0 %v1333_v8  ;;  %913 = vmatpush1.bf16.msra.mxu1 %v1364_v19  ;;  %v1365_v38 = vld [vmem:[#allocation7 + $0x68] ss:$24 sps:$4 sm:$0xff]   ;;  %v1392_v40 = vld [vmem:[#allocation7 + $0x154] ss:$24 sps:$4 sm:$0xff]   ;;  %v1383_v50 = vld [vmem:[#allocation7 + $0xf8] ss:$24 sps:$4 sm:$0xff]  }
  0x47   :  { %211 = vmatprep.subr.bf16.mxu0 %v1334_v9  ;;  %914 = vmatprep.subr.bf16.mxu1 %v1368_v21  ;;  %v1394_v41 = vld [vmem:[#allocation7 + $0x150] ss:$24 sps:$4 sm:$0xff]   ;;  %v1379_v44 = vld [vmem:[#allocation7 + $0xcc] ss:$24 sps:$4 sm:$0xff]   ;;  %v1400_v46 = vld [vmem:[#allocation7 + $0x180] ss:$24 sps:$4 sm:$0xff]  }
  0x48   :  { %v1377_v47 = vld [vmem:[#allocation7 + $0xc8] ss:$24 sps:$4 sm:$0xff]   ;;  %v1385_v48 = vld [vmem:[#allocation7 + $0xfc] ss:$24 sps:$4 sm:$0xff]   ;;  %v1391_v52 = vld [vmem:[#allocation7 + $0x12c] ss:$24 sps:$4 sm:$0xff]  }
  0x49   :  { %v1404_v49 = vld [vmem:[#allocation7 + $0x1b4] ss:$24 sps:$4 sm:$0xff]   ;;  %v1406_v51 = vld [vmem:[#allocation7 + $0x1b0] ss:$24 sps:$4 sm:$0xff]   ;;  %v1410_v53 = vld [vmem:[#allocation7 + $0x1e4] ss:$24 sps:$4 sm:$0xff]  }
  0x4a   :  { %212 = vmatpush1.bf16.msra.mxu0 %v1336_v10  ;;  %915 = vmatpush1.bf16.msra.mxu1 %v1370_v23  ;;  %v1349_v54 = vld [vmem:[#allocation2 + $0x18] sm:$0xff]   ;;  %v1389_v56 = vld [vmem:[#allocation7 + $0x128] ss:$24 sps:$4 sm:$0xff]   ;;  %v1416_v57 = vld [vmem:[#allocation7 + $0x214] ss:$24 sps:$4 sm:$0xff]  }
  0x4b   :  { %213 = vmatprep.subr.bf16.mxu0 %v1337_v13  ;;  %916 = vmatprep.subr.bf16.mxu1 %v1374_v25  ;;  %v1412_v55 = vld [vmem:[#allocation7 + $0x1e0] ss:$24 sps:$4 sm:$0xff]   ;;  %v1397_v58 = vld [vmem:[#allocation7 + $0x15c] ss:$24 sps:$4 sm:$0xff]   ;;  %v1418_v59 = vld [vmem:[#allocation7 + $0x210] ss:$24 sps:$4 sm:$0xff]  }
  0x4c   :  { %v1395_v60 = vld [vmem:[#allocation7 + $0x158] ss:$24 sps:$4 sm:$0xff]   ;;  %v1422_v61 = vld [vmem:[#allocation7 + $0x244] ss:$24 sps:$4 sm:$0xff]   ;;  %v1428_v1 = vld [vmem:[#allocation7 + $0x274] ss:$24 sps:$4 sm:$0xff]  }
  0x4d   :  { %v1403_v62 = vld [vmem:[#allocation7 + $0x18c] ss:$24 sps:$4 sm:$0xff]   ;;  %v1424_v63 = vld [vmem:[#allocation7 + $0x240] ss:$24 sps:$4 sm:$0xff]   ;;  %v1409_v2 = vld [vmem:[#allocation7 + $0x1bc] ss:$24 sps:$4 sm:$0xff]  }
  0x4e   :  { %214 = vmatpush1.bf16.msra.mxu0 %v1339_v16  ;;  %917 = vmatpush1.bf16.msra.mxu1 %v1376_v28  ;;  %v1430_v3 = vld [vmem:[#allocation7 + $0x270] ss:$24 sps:$4 sm:$0xff]   ;;  %v1415_v5 = vld [vmem:[#allocation7 + $0x1ec] ss:$24 sps:$4 sm:$0xff]   ;;  %v1421_v7 = vld [vmem:[#allocation7 + $0x21c] ss:$24 sps:$4 sm:$0xff]  }
  0x4f   :  { %215 = vmatprep.subr.bf16.mxu0 %v1340_v17  ;;  %918 = vmatprep.subr.bf16.mxu1 %v1380_v31  ;;  %v1407_v4 = vld [vmem:[#allocation7 + $0x1b8] ss:$24 sps:$4 sm:$0xff]   ;;  %v1413_v6 = vld [vmem:[#allocation7 + $0x1e8] ss:$24 sps:$4 sm:$0xff]   ;;  %v1427_v9 = vld [vmem:[#allocation7 + $0x24c] ss:$24 sps:$4 sm:$0xff]  }
  0x50   :  { %v1419_v8 = vld [vmem:[#allocation7 + $0x218] ss:$24 sps:$4 sm:$0xff]   ;;  %v1425_v10 = vld [vmem:[#allocation7 + $0x248] ss:$24 sps:$4 sm:$0xff]   ;;  %v1433_v11 = vld [vmem:[#allocation7 + $0x27c] ss:$24 sps:$4 sm:$0xff]  }
  0x51   :  { %v1431_v12 = vld [vmem:[#allocation7 + $0x278] ss:$24 sps:$4 sm:$0xff]   ;;  %v1434_v13 = vld [vmem:[#allocation7 + $0x2a4] ss:$24 sps:$4 sm:$0xff]   ;;  %v1437_v16 = vld [vmem:[#allocation7 + $0x2a8] ss:$24 sps:$4 sm:$0xff]  }
  0x52   :  { %216 = vmatpush1.bf16.msra.mxu0 %v1342_v20  ;;  %919 = vmatpush1.bf16.msra.mxu1 %v1382_v32  ;;  %v1436_v14 = vld [vmem:[#allocation7 + $0x2a0] ss:$24 sps:$4 sm:$0xff]   ;;  %v1439_v15 = vld [vmem:[#allocation7 + $0x2ac] ss:$24 sps:$4 sm:$0xff]   ;;  %v1442_v18 = vld [vmem:[#allocation7 + $0x2d0] ss:$24 sps:$4 sm:$0xff]  }
  0x53   :  { %217 = vmatprep.subr.bf16.mxu0 %v1343_v22  ;;  %920 = vmatprep.subr.bf16.mxu1 %v1386_v34  ;;  %v1440_v17 = vld [vmem:[#allocation7 + $0x2d4] ss:$24 sps:$4 sm:$0xff]   ;;  %v1443_v20 = vld [vmem:[#allocation7 + $0x2d8] ss:$24 sps:$4 sm:$0xff]   ;;  %v89_v22 = vlaneseq  ;;  %v87_v25 = vld [vmem:[%s1805_s2] sm:$0x3] }
  0x54   :  { %v1445_v19 = vld [vmem:[#allocation7 + $0x2dc] ss:$24 sps:$4 sm:$0xff]  }
  0x55   :  { %v1448_v21 = vld [vmem:[#allocation7 + $0x14] ss:$24 sps:$4 sm:$0xff]   ;;  %v1671_v23 = vshrl.u32 %v89_v22, 7 }
  0x56   :  { %218 = vmatpush1.bf16.msra.mxu0 %v1345_v24  ;;  %921 = vmatpush1.bf16.msra.mxu1 %v1388_v37 }
  0x57   :  { %981 = vmatprep.subr.bf16.mxu0 %v1355_v26  ;;  %922 = vmatprep.subr.bf16.mxu1 %v1392_v40  ;;  %v91_v24 = vsub.s32 0, %v1671_v23  ;;  %v95_v26 = vsub.s32 1, %v1671_v23 }
  0x59   :  { %236 = vmatmul.mubr.bf16.vlgmr.msra.gmra.mrb[0].mxu0 %v1346_v27  ;;  %v1680_v27 = vrot.slane %v87_v25, %v91_v24  ;;  %v1684_v28 = vrot.slane %v87_v25, %v95_v26 }
  0x5a   :  { %245 = vmatprep.mubr.bf16.mxu0 %v1597_v0  ;;  %982 = vmatpush1.bf16.msra.mxu0 %v1353_v29 }
  0x5b   :  { %983 = vmatprep.subr.bf16.mxu0 %v1361_v30  ;;  %923 = vmatpush1.bf16.msra.mxu1 %v1394_v41 }
  0x5c   :  { %924 = vmatprep.subr.bf16.mxu1 %v1398_v43 }
  0x5e   :  { %984 = vmatpush1.bf16.msra.mxu0 %v1359_v33 }
  0x5f   :  { %985 = vmatprep.subr.bf16.mxu0 %v1367_v35  ;;  %925 = vmatpush1.bf16.msra.mxu1 %v1400_v46 }
  0x60   :  { %926 = vmatprep.subr.bf16.mxu1 %v1404_v49 }
  0x61   :  { %246 = vmatmul.mubr.bf16.gmra.mrb[4].mxu0 %v1347_v36 }
  0x62   :  { %255 = vmatprep.mubr.bf16.mxu0 %v1597_v0  ;;  %986 = vmatpush1.bf16.msra.mxu0 %v1365_v38 }
  0x63   :  { %987 = vmatprep.subr.bf16.mxu0 %v1373_v39  ;;  %927 = vmatpush1.bf16.msra.mxu1 %v1406_v51 }
  0x64   :  { %928 = vmatprep.subr.bf16.mxu1 %v1410_v53 }
  0x66   :  { %988 = vmatpush1.bf16.msra.mxu0 %v1371_v42 }
  0x67   :  { %989 = vmatprep.subr.bf16.mxu0 %v1379_v44  ;;  %929 = vmatpush1.bf16.msra.mxu1 %v1412_v55  ;;  %v1446_v44 = vld [vmem:[#allocation7 + $0x10] ss:$24 sps:$4 sm:$0xff]   ;;  %v1449_v55 = vld [vmem:[#allocation7 + $0x40] ss:$24 sps:$4 sm:$0xff]  }
  0x68   :  { %930 = vmatprep.subr.bf16.mxu1 %v1416_v57  ;;  %v1454_v57 = vld [vmem:[#allocation7 + $0x74] ss:$24 sps:$4 sm:$0xff]  }
  0x69   :  { %256 = vmatmul.mubr.bf16.gmra.mrb[8].mxu0 %v1348_v45 }
  0x6a   :  { %265 = vmatprep.mubr.bf16.mxu0 %v1597_v0  ;;  %990 = vmatpush1.bf16.msra.mxu0 %v1377_v47  ;;  %v1401_v0 = vld [vmem:[#allocation7 + $0x188] ss:$24 sps:$4 sm:$0xff]   ;;  %v1451_v47 = vld [vmem:[#allocation7 + $0x44] ss:$24 sps:$4 sm:$0xff]  }
  0x6b   :  { %991 = vmatprep.subr.bf16.mxu0 %v1385_v48  ;;  %931 = vmatpush1.bf16.msra.mxu1 %v1418_v59 }
  0x6c   :  { %932 = vmatprep.subr.bf16.mxu1 %v1422_v61 }
  0x6e   :  { %992 = vmatpush1.bf16.msra.mxu0 %v1383_v50 }
  0x6f   :  { %993 = vmatprep.subr.bf16.mxu0 %v1391_v52  ;;  %933 = vmatpush1.bf16.msra.mxu1 %v1424_v63 }
  0x70   :  { %934 = vmatprep.subr.bf16.mxu1 %v1428_v1  ;;  %v1457_v1 = vld [vmem:[#allocation7 + $0xa4] ss:$24 sps:$4 sm:$0xff]  }
  0x71   :  { %266 = vmatmul.mubr.bf16.gmra.mrb[12].mxu0 %v1349_v54 }
  0x72   :  { %994 = vmatpush1.bf16.msra.mxu0 %v1389_v56 }
  0x73   :  { %995 = vmatprep.subr.bf16.mxu0 %v1397_v58  ;;  %935 = vmatpush1.bf16.msra.mxu1 %v1430_v3 }
  0x74   :  { %936 = vmatprep.subr.bf16.mxu1 %v1434_v13 }
  0x76   :  { %996 = vmatpush1.bf16.msra.mxu0 %v1395_v60 }
  0x77   :  { %997 = vmatprep.subr.bf16.mxu0 %v1403_v62  ;;  %937 = vmatpush1.bf16.msra.mxu1 %v1436_v14  ;;  %v1452_v62 = vld [vmem:[#allocation7 + $0x70] ss:$24 sps:$4 sm:$0xff]  }
  0x78   :  { %938 = vmatprep.subr.bf16.mxu1 %v1440_v17 }
  0x7a   :  { %998 = vmatpush1.bf16.msra.mxu0 %v1401_v0 }
  0x7b   :  { %999 = vmatprep.subr.bf16.mxu0 %v1409_v2  ;;  %939 = vmatpush1.bf16.msra.mxu1 %v1442_v18 }
  0x7c   :  { %1054 = vmatprep.subr.bf16.mxu1 %v1448_v21 }
  0x7e   :  { %1000 = vmatpush1.bf16.msra.mxu0 %v1407_v4 }
  0x7f   :  { %1001 = vmatprep.subr.bf16.mxu0 %v1415_v5 }
  0x82   :  { %1002 = vmatpush1.bf16.msra.mxu0 %v1413_v6 }
  0x83   :  { %1003 = vmatprep.subr.bf16.mxu0 %v1421_v7 }
  0x86   :  { %1004 = vmatpush1.bf16.msra.mxu0 %v1419_v8 }
  0x87   :  { %1005 = vmatprep.subr.bf16.mxu0 %v1427_v9  ;;  %v1455_v9 = vld [vmem:[#allocation7 + $0xa0] ss:$24 sps:$4 sm:$0xff]  }
  0x8a   :  { %1006 = vmatpush1.bf16.msra.mxu0 %v1425_v10 }
  0x8b   :  { %1007 = vmatprep.subr.bf16.mxu0 %v1433_v11  ;;  %v1460_v11 = vld [vmem:[#allocation7 + $0xd4] ss:$24 sps:$4 sm:$0xff]  }
  0x8e   :  { %1008 = vmatpush1.bf16.msra.mxu0 %v1431_v12 }
  0x8f   :  { %1009 = vmatprep.subr.bf16.mxu0 %v1439_v15 }
  0x92   :  { %1010 = vmatpush1.bf16.msra.mxu0 %v1437_v16  ;;  %v1458_v16 = vld [vmem:[#allocation7 + $0xd0] ss:$24 sps:$4 sm:$0xff]  }
  0x93   :  { %1011 = vmatprep.subr.bf16.mxu0 %v1445_v19  ;;  %v1463_v19 = vld [vmem:[#allocation7 + $0x104] ss:$24 sps:$4 sm:$0xff]  }
  0x96   :  { %1012 = vmatpush1.bf16.msra.mxu0 %v1443_v20 }
 0x12c   :  { %v237_v29 = vpop.f32.mrb[0].mxu0 }
 0x12d   :  { %v238_v30 = vadd.f32 %v237_v29, %v1680_v27  ;;  %v239_v31 = vpop.f32.mrb[1].mxu0 }
 0x12e   :  { %v240_v32 = vadd.f32 %v239_v31, %v1684_v28  ;;  %v241_v33 = vpop.f32.mrb[2].mxu0 }
 0x12f   :  { %v242_v34 = vadd.f32 %v241_v33, %v1680_v27  ;;  %v243_v35 = vpop.f32.mrb[3].mxu0  ;;  %v276_v37 = vmax.f32 %v238_v30, 0.0 }
 0x130   :  { %v244_v36 = vadd.f32 %v243_v35, %v1684_v28  ;;  %v277_v39 = vmax.f32 %v240_v32, 0.0  ;;  %v1461_v32 = vld [vmem:[#allocation7 + $0x100] ss:$24 sps:$4 sm:$0xff]  }
 0x131   :  { %v278_v38 = vmax.f32 %v242_v34, 0.0  ;;  %v1466_v34 = vld [vmem:[#allocation7 + $0x134] ss:$24 sps:$4 sm:$0xff]  }
 0x132   :  { %v279_v40 = vmax.f32 %v244_v36, 0.0 }
 0x133   :  { %v1690_v41 = vpack.c.bf16 %v278_v38, %v276_v37  ;;  %v1464_v38 = vld [vmem:[#allocation7 + $0x130] ss:$24 sps:$4 sm:$0xff]  }
 0x134   :  { %v1692_v42 = vpack.c.bf16 %v279_v40, %v277_v39  ;;  %v247_v43 = vpop.f32.mrb[4].mxu0  ;;  %v1472_v39 = vld [vmem:[#allocation7 + $0x194] ss:$24 sps:$4 sm:$0xff]   ;;  %v1470_v40 = vld [vmem:[#allocation7 + $0x190] ss:$24 sps:$4 sm:$0xff]  }
 0x135   :  { %v248_v45 = vadd.f32 %v247_v43, %v1680_v27  ;;  %v249_v46 = vpop.f32.mrb[5].mxu0  ;;  %v1475_v43 = vld [vmem:[#allocation7 + $0x1c4] ss:$24 sps:$4 sm:$0xff]  }
 0x136   :  { %v250_v48 = vadd.f32 %v249_v46, %v1684_v28  ;;  %v251_v49 = vpop.f32.mrb[6].mxu0  ;;  %940 = vmatprep.mubr.bf16.mxu1 %v1692_v42  ;;  %1013 = vmatprep.mubr.bf16.mxu0 %v1692_v42  ;;  %v1476_v46 = vld [vmem:[#allocation7 + $0x1f0] ss:$24 sps:$4 sm:$0xff]  }
 0x137   :  { %v280_v50 = vmax.f32 %v248_v45, 0.0  ;;  %v252_v51 = vadd.f32 %v251_v49, %v1680_v27  ;;  %v253_v52 = vpop.f32.mrb[7].mxu0  ;;  %941 = vmatmul.mubr.bf16.vlgmr.msra.gmra.mrb[0].mxu1 %v1690_v41  ;;  %1014 = vmatmul.mubr.bf16.vlgmr.msra.gmra.mrb[16].mxu0 %v1690_v41  ;;  %v1478_v45 = vld [vmem:[#allocation7 + $0x1f4] ss:$24 sps:$4 sm:$0xff]  }
 0x138   :  { %v281_v53 = vmax.f32 %v250_v48, 0.0  ;;  %v254_v54 = vadd.f32 %v253_v52, %v1684_v28  ;;  %1055 = vmatpush1.bf16.msra.mxu1 %v1446_v44  ;;  %v1473_v44 = vld [vmem:[#allocation7 + $0x1c0] ss:$24 sps:$4 sm:$0xff]   ;;  %v1484_v49 = vld [vmem:[#allocation7 + $0x254] ss:$24 sps:$4 sm:$0xff]  }
 0x139   :  { %v282_v56 = vmax.f32 %v252_v51, 0.0  ;;  %1056 = vmatprep.subr.bf16.mxu1 %v1451_v47  ;;  %v1481_v47 = vld [vmem:[#allocation7 + $0x224] ss:$24 sps:$4 sm:$0xff]   ;;  %v1479_v48 = vld [vmem:[#allocation7 + $0x220] ss:$24 sps:$4 sm:$0xff]  }
 0x13a   :  { %v283_v58 = vmax.f32 %v254_v54, 0.0  ;;  %v1485_v51 = vld [vmem:[#allocation7 + $0x280] ss:$24 sps:$4 sm:$0xff]   ;;  %v1490_v52 = vld [vmem:[#allocation7 + $0x2b4] ss:$24 sps:$4 sm:$0xff]  }
 0x13b   :  { %v1702_v59 = vpack.c.bf16 %v282_v56, %v280_v50  ;;  %v1487_v50 = vld [vmem:[#allocation7 + $0x284] ss:$24 sps:$4 sm:$0xff]   ;;  %v408_v56 = vsub.s32 2, %v1671_v23 }
 0x13c   :  { %v1704_v60 = vpack.c.bf16 %v283_v58, %v281_v53  ;;  %1057 = vmatpush1.bf16.msra.mxu1 %v1449_v55  ;;  %v257_v61 = vpop.f32.mrb[8].mxu0  ;;  %v1488_v53 = vld [vmem:[#allocation7 + $0x2b0] ss:$24 sps:$4 sm:$0xff]   ;;  %v1493_v54 = vld [vmem:[#allocation7 + $0x2e4] ss:$24 sps:$4 sm:$0xff]   ;;  %v412_v58 = vsub.s32 3, %v1671_v23 }
 0x13d   :  { %v258_v63 = vadd.f32 %v257_v61, %v1680_v27  ;;  %v259_v0 = vpop.f32.mrb[9].mxu0  ;;  %1058 = vmatprep.subr.bf16.mxu1 %v1454_v57  ;;  %v1491_v55 = vld [vmem:[#allocation7 + $0x2e0] ss:$24 sps:$4 sm:$0xff]  }
 0x13e   :  { %v260_v2 = vadd.f32 %v259_v0, %v1684_v28  ;;  %v261_v3 = vpop.f32.mrb[10].mxu0  ;;  %950 = vmatprep.mubr.bf16.mxu1 %v1704_v60  ;;  %1023 = vmatprep.mubr.bf16.mxu0 %v1704_v60  ;;  %v1736_v57 = vld [vmem:[%s1807_s4] sm:$0x3f]  ;;  %s1598_s4 = smov [#allocation8]  }
 0x13f   :  { %v284_v4 = vmax.f32 %v258_v63, 0.0  ;;  %v262_v5 = vadd.f32 %v261_v3, %v1680_v27  ;;  %v263_v6 = vpop.f32.mrb[11].mxu0  ;;  %951 = vmatmul.mubr.bf16.gmra.mrb[4].mxu1 %v1702_v59  ;;  %1024 = vmatmul.mubr.bf16.gmra.mrb[20].mxu0 %v1702_v59  ;;  %v1753_v61 = vrot.slane %v1736_v57, %v412_v58  ;;  %s1180_s10 = sshll.u32 %s1598_s4, 4  ;;  %s1181_s10 = int_to_ptr.vmem [resolvable:$true] %s1180_s10 }
 0x140   :  { %v285_v7 = vmax.f32 %v260_v2, 0.0  ;;  %v264_v8 = vadd.f32 %v263_v6, %v1684_v28  ;;  %1059 = vmatpush1.bf16.msra.mxu1 %v1452_v62  ;;  %s1560_s11 = scalar_lea.vmem %s1181_s10, 6144  ;;  %p1565_p11 = scmp.lt.s32.totalorder %s1181_s10, %s1181_s10 }
 0x141   :  { %v286_v10 = vmax.f32 %v262_v5, 0.0  ;;  %1060 = vmatprep.subr.bf16.mxu1 %v1457_v1  ;;  %p1561_p10 = scmp.ne.s32.totalorder %s1181_s10, %s1560_s11  ;;  %p1566_p12 = scmp.lt.s32.totalorder %s1560_s11, %s1560_s11 }
 0x142   :  { %v287_v12 = vmax.f32 %v264_v8, 0.0 }
 0x143   :  { %v1714_v13 = vpack.c.bf16 %v286_v10, %v284_v4  ;;  %p1567_p13 = por %p1566_p12, %p1565_p11 }
 0x144   :  { %v1716_v14 = vpack.c.bf16 %v287_v12, %v285_v7  ;;  %1061 = vmatpush1.bf16.msra.mxu1 %v1455_v9  ;;  %v267_v15 = vpop.f32.mrb[12].mxu0 }
 0x145   :  { %v268_v17 = vadd.f32 %v267_v15, %v1680_v27  ;;  %v269_v18 = vpop.f32.mrb[13].mxu0  ;;  %1062 = vmatprep.subr.bf16.mxu1 %v1460_v11  ;;  %p1568_p0 = pnand %p1567_p13, %p1561_p10 }
 0x146   :  { %v270_v20 = vadd.f32 %v269_v18, %v1684_v28  ;;  %v271_v21 = vpop.f32.mrb[14].mxu0  ;;  %960 = vmatprep.mubr.bf16.mxu1 %v1716_v14  ;;  %1033 = vmatprep.mubr.bf16.mxu0 %v1716_v14 }
 0x147   :  { %v288_v22 = vmax.f32 %v268_v17, 0.0  ;;  %v272_v25 = vadd.f32 %v271_v21, %v1680_v27  ;;  %v273_v29 = vpop.f32.mrb[15].mxu0  ;;  %961 = vmatmul.mubr.bf16.gmra.mrb[8].mxu1 %v1714_v13  ;;  %1034 = vmatmul.mubr.bf16.gmra.mrb[24].mxu0 %v1714_v13  ;;  %v1469_v27 = vld [vmem:[#allocation7 + $0x164] ss:$24 sps:$4 sm:$0xff]  }
 0x148   :  { %v289_v30 = vmax.f32 %v270_v20, 0.0  ;;  %v274_v31 = vadd.f32 %v273_v29, %v1684_v28  ;;  %1063 = vmatpush1.bf16.msra.mxu1 %v1458_v16  ;;  %v1467_v28 = vld [vmem:[#allocation7 + $0x160] ss:$24 sps:$4 sm:$0xff]  }
 0x149   :  { %v290_v33 = vmax.f32 %v272_v25, 0.0  ;;  %1064 = vmatprep.subr.bf16.mxu1 %v1463_v19 }
 0x14a   :  { %v291_v35 = vmax.f32 %v274_v31, 0.0 }
 0x14b   :  { %v298_v36 = vpack.c.bf16 %v290_v33, %v288_v22 }
 0x14c   :  { %v299_v37 = vpack.c.bf16 %v291_v35, %v289_v30  ;;  %1065 = vmatpush1.bf16.msra.mxu1 %v1461_v32 }
 0x14d   :  { %1066 = vmatprep.subr.bf16.mxu1 %v1466_v34 }
 0x14e   :  { %970 = vmatprep.mubr.bf16.mxu1 %v299_v37  ;;  %1043 = vmatprep.mubr.bf16.mxu0 %v299_v37 }
 0x14f   :  { %971 = vmatmul.mubr.bf16.gmra.mrb[12].mxu1 %v298_v36  ;;  %1044 = vmatmul.mubr.bf16.gmra.mrb[28].mxu0 %v298_v36 }
 0x150   :  { %1067 = vmatpush1.bf16.msra.mxu1 %v1464_v38  ;;  %1086 = vmatprep.mubr.bf16.mxu1 %v1692_v42  ;;  %v1482_v42 = vld [vmem:[#allocation7 + $0x250] ss:$24 sps:$4 sm:$0xff]  }
 0x151   :  { %1068 = vmatprep.subr.bf16.mxu1 %v1469_v27 }
 0x154   :  { %1069 = vmatpush1.bf16.msra.mxu1 %v1467_v28 }
 0x155   :  { %1070 = vmatprep.subr.bf16.mxu1 %v1472_v39 }
 0x158   :  { %1071 = vmatpush1.bf16.msra.mxu1 %v1470_v40 }
 0x159   :  { %1072 = vmatprep.subr.bf16.mxu1 %v1475_v43 }
 0x15c   :  { %1073 = vmatpush1.bf16.msra.mxu1 %v1473_v44 }
 0x15d   :  { %1074 = vmatprep.subr.bf16.mxu1 %v1478_v45 }
 0x160   :  { %1075 = vmatpush1.bf16.msra.mxu1 %v1476_v46 }
 0x161   :  { %1076 = vmatprep.subr.bf16.mxu1 %v1481_v47 }
 0x164   :  { %1077 = vmatpush1.bf16.msra.mxu1 %v1479_v48 }
 0x165   :  { %1078 = vmatprep.subr.bf16.mxu1 %v1484_v49 }
 0x168   :  { %1079 = vmatpush1.bf16.msra.mxu1 %v1482_v42 }
 0x169   :  { %1080 = vmatprep.subr.bf16.mxu1 %v1487_v50 }
 0x16c   :  { %1081 = vmatpush1.bf16.msra.mxu1 %v1485_v51 }
 0x16d   :  { %1082 = vmatprep.subr.bf16.mxu1 %v1490_v52 }
 0x170   :  { %1083 = vmatpush1.bf16.msra.mxu1 %v1488_v53 }
 0x171   :  { %1084 = vmatprep.subr.bf16.mxu1 %v1493_v54 }
 0x174   :  { %1085 = vmatpush1.bf16.msra.mxu1 %v1491_v55 }
 0x177   :  { %1087 = vmatmul.mubr.bf16.vlgmr.msra.gmra.mrb[16].mxu1 %v1690_v41  ;;  %v1742_v41 = vrot.slane %v1736_v57, %v91_v24 }
 0x178   :  { %1096 = vmatprep.mubr.bf16.mxu1 %v1704_v60  ;;  %v1750_v60 = vrot.slane %v1736_v57, %v95_v26 }
 0x17f   :  { %1097 = vmatmul.mubr.bf16.gmra.mrb[20].mxu1 %v1702_v59  ;;  %v1745_v59 = vrot.slane %v1736_v57, %v408_v56 }
 0x180   :  { %1106 = vmatprep.mubr.bf16.mxu1 %v1716_v14 }
 0x187   :  { %1107 = vmatmul.mubr.bf16.gmra.mrb[24].mxu1 %v1714_v13 }
 0x188   :  { %1116 = vmatprep.mubr.bf16.mxu1 %v299_v37 }
 0x18f   :  { %1117 = vmatmul.mubr.bf16.gmra.mrb[28].mxu1 %v298_v36 }
 0x20a   :  { %v942_v62 = vpop.f32.mrb[0].mxu1  ;;  %v1015_v63 = vpop.f32.mrb[16].mxu0 }
 0x20b   :  { %v943_v0 = vadd.f32 %v942_v62, %v1742_v41  ;;  %v1016_v1 = vadd.f32 %v1015_v63, %v1745_v59  ;;  %v944_v2 = vpop.f32.mrb[1].mxu1  ;;  %v1017_v24 = vpop.f32.mrb[17].mxu0 }
 0x20c   :  { %v945_v3 = vadd.f32 %v944_v2, %v1750_v60  ;;  %v1018_v4 = vadd.f32 %v1017_v24, %v1753_v61  ;;  %v946_v5 = vpop.f32.mrb[2].mxu1  ;;  %v1019_v6 = vpop.f32.mrb[18].mxu0 }
 0x20d   :  { %1127 = vst [vmem:[#allocation8] sm:$0xff] %v943_v0  ;;  %1129 = vst [vmem:[#allocation8 + $0x10] sm:$0xff] %v1016_v1  ;;  %v947_v26 = vadd.f32 %v946_v5, %v1742_v41  ;;  %v1020_v7 = vadd.f32 %v1019_v6, %v1745_v59  ;;  %v948_v8 = vpop.f32.mrb[3].mxu1  ;;  %v1021_v9 = vpop.f32.mrb[19].mxu0 }
 0x20e   :  { %1128 = vst [vmem:[#allocation8 + $0x8] sm:$0xff] %v945_v3  ;;  %1130 = vst [vmem:[#allocation8 + $0x18] sm:$0xff] %v1018_v4  ;;  %v949_v10 = vadd.f32 %v948_v8, %v1750_v60  ;;  %v1022_v11 = vadd.f32 %v1021_v9, %v1753_v61  ;;  %v416_v3 = vsub.s32 4, %v1671_v23  ;;  %v420_v4 = vsub.s32 5, %v1671_v23 }
 0x20f   :  { %1133 = vst [vmem:[#allocation8 + $0x30] sm:$0xff] %v947_v26  ;;  %1135 = vst [vmem:[#allocation8 + $0x40] sm:$0xff] %v1020_v7 }
 0x210   :  { %1134 = vst [vmem:[#allocation8 + $0x38] sm:$0xff] %v949_v10  ;;  %1136 = vst [vmem:[#allocation8 + $0x48] sm:$0xff] %v1022_v11 }
 0x212   :  { %v952_v12 = vpop.f32.mrb[4].mxu1  ;;  %v1025_v13 = vpop.f32.mrb[20].mxu0 }
 0x213   :  { %v953_v14 = vadd.f32 %v952_v12, %v1742_v41  ;;  %v1026_v15 = vadd.f32 %v1025_v13, %v1745_v59  ;;  %v954_v16 = vpop.f32.mrb[5].mxu1  ;;  %v1027_v17 = vpop.f32.mrb[21].mxu0 }
 0x214   :  { %v955_v18 = vadd.f32 %v954_v16, %v1750_v60  ;;  %v1028_v19 = vadd.f32 %v1027_v17, %v1753_v61  ;;  %v956_v20 = vpop.f32.mrb[6].mxu1  ;;  %v1029_v21 = vpop.f32.mrb[22].mxu0 }
 0x215   :  { %1139 = vst [vmem:[#allocation8 + $0x60] sm:$0xff] %v953_v14  ;;  %1141 = vst [vmem:[#allocation8 + $0x70] sm:$0xff] %v1026_v15  ;;  %v957_v22 = vadd.f32 %v956_v20, %v1742_v41  ;;  %v1030_v25 = vadd.f32 %v1029_v21, %v1745_v59  ;;  %v958_v29 = vpop.f32.mrb[7].mxu1  ;;  %v1031_v30 = vpop.f32.mrb[23].mxu0 }
 0x216   :  { %1140 = vst [vmem:[#allocation8 + $0x68] sm:$0xff] %v955_v18  ;;  %1142 = vst [vmem:[#allocation8 + $0x78] sm:$0xff] %v1028_v19  ;;  %v959_v31 = vadd.f32 %v958_v29, %v1750_v60  ;;  %v1032_v32 = vadd.f32 %v1031_v30, %v1753_v61 }
 0x217   :  { %1145 = vst [vmem:[#allocation8 + $0x90] sm:$0xff] %v957_v22  ;;  %1147 = vst [vmem:[#allocation8 + $0xa0] sm:$0xff] %v1030_v25 }
 0x218   :  { %1146 = vst [vmem:[#allocation8 + $0x98] sm:$0xff] %v959_v31  ;;  %1148 = vst [vmem:[#allocation8 + $0xa8] sm:$0xff] %v1032_v32 }
 0x21a   :  { %v962_v33 = vpop.f32.mrb[8].mxu1  ;;  %v1035_v34 = vpop.f32.mrb[24].mxu0 }
 0x21b   :  { %v963_v35 = vadd.f32 %v962_v33, %v1742_v41  ;;  %v1036_v36 = vadd.f32 %v1035_v34, %v1745_v59  ;;  %v964_v37 = vpop.f32.mrb[9].mxu1  ;;  %v1037_v38 = vpop.f32.mrb[25].mxu0 }
 0x21c   :  { %v965_v27 = vadd.f32 %v964_v37, %v1750_v60  ;;  %v1038_v28 = vadd.f32 %v1037_v38, %v1753_v61  ;;  %v966_v39 = vpop.f32.mrb[10].mxu1  ;;  %v1039_v40 = vpop.f32.mrb[26].mxu0 }
 0x21d   :  { %1151 = vst [vmem:[#allocation8 + $0xc0] sm:$0xff] %v963_v35  ;;  %1153 = vst [vmem:[#allocation8 + $0xd0] sm:$0xff] %v1036_v36  ;;  %v967_v43 = vadd.f32 %v966_v39, %v1742_v41  ;;  %v1040_v44 = vadd.f32 %v1039_v40, %v1745_v59  ;;  %v968_v45 = vpop.f32.mrb[11].mxu1  ;;  %v1041_v46 = vpop.f32.mrb[27].mxu0 }
 0x21e   :  { %1152 = vst [vmem:[#allocation8 + $0xc8] sm:$0xff] %v965_v27  ;;  %1154 = vst [vmem:[#allocation8 + $0xd8] sm:$0xff] %v1038_v28  ;;  %v969_v47 = vadd.f32 %v968_v45, %v1750_v60  ;;  %v1042_v48 = vadd.f32 %v1041_v46, %v1753_v61 }
 0x21f   :  { %1157 = vst [vmem:[#allocation8 + $0xf0] sm:$0xff] %v967_v43  ;;  %1159 = vst [vmem:[#allocation8 + $0x100] sm:$0xff] %v1040_v44 }
 0x220   :  { %1158 = vst [vmem:[#allocation8 + $0xf8] sm:$0xff] %v969_v47  ;;  %1160 = vst [vmem:[#allocation8 + $0x108] sm:$0xff] %v1042_v48 }
 0x222   :  { %v972_v49 = vpop.f32.mrb[12].mxu1  ;;  %v1045_v42 = vpop.f32.mrb[28].mxu0 }
 0x223   :  { %v973_v50 = vadd.f32 %v972_v49, %v1742_v41  ;;  %v1046_v51 = vadd.f32 %v1045_v42, %v1745_v59  ;;  %v974_v52 = vpop.f32.mrb[13].mxu1  ;;  %v1047_v53 = vpop.f32.mrb[29].mxu0 }
 0x224   :  { %v975_v54 = vadd.f32 %v974_v52, %v1750_v60  ;;  %v1048_v55 = vadd.f32 %v1047_v53, %v1753_v61  ;;  %v976_v56 = vpop.f32.mrb[14].mxu1  ;;  %v1049_v58 = vpop.f32.mrb[30].mxu0 }
 0x225   :  { %1163 = vst [vmem:[#allocation8 + $0x120] sm:$0xff] %v973_v50  ;;  %1165 = vst [vmem:[#allocation8 + $0x130] sm:$0xff] %v1046_v51  ;;  %v977_v62 = vadd.f32 %v976_v56, %v1742_v41  ;;  %v1050_v63 = vadd.f32 %v1049_v58, %v1745_v59  ;;  %v978_v0 = vpop.f32.mrb[15].mxu1  ;;  %v1051_v1 = vpop.f32.mrb[31].mxu0  ;;  %v417_v41 = vrot.slane %v1736_v57, %v416_v3 }
 0x226   :  { %1164 = vst [vmem:[#allocation8 + $0x128] sm:$0xff] %v975_v54  ;;  %1166 = vst [vmem:[#allocation8 + $0x138] sm:$0xff] %v1048_v55  ;;  %v979_v2 = vadd.f32 %v978_v0, %v1750_v60  ;;  %v1052_v24 = vadd.f32 %v1051_v1, %v1753_v61  ;;  %v421_v59 = vrot.slane %v1736_v57, %v420_v4 }
 0x227   :  { %1169 = vst [vmem:[#allocation8 + $0x150] sm:$0xff] %v977_v62  ;;  %1171 = vst [vmem:[#allocation8 + $0x160] sm:$0xff] %v1050_v63 }
 0x228   :  { %1170 = vst [vmem:[#allocation8 + $0x158] sm:$0xff] %v979_v2  ;;  %1172 = vst [vmem:[#allocation8 + $0x168] sm:$0xff] %v1052_v24 }
 0x24a   :  { %v1088_v5 = vpop.f32.mrb[16].mxu1 }
 0x24b   :  { %v1089_v6 = vadd.f32 %v1088_v5, %v417_v41  ;;  %v1090_v26 = vpop.f32.mrb[17].mxu1 }
 0x24c   :  { %v1091_v7 = vadd.f32 %v1090_v26, %v421_v59  ;;  %v1092_v8 = vpop.f32.mrb[18].mxu1 }
 0x24d   :  { %1131 = vst [vmem:[#allocation8 + $0x20] sm:$0xff] %v1089_v6  ;;  %v1093_v60 = vadd.f32 %v1092_v8, %v417_v41  ;;  %v1094_v61 = vpop.f32.mrb[19].mxu1 }
 0x24e   :  { %1132 = vst [vmem:[#allocation8 + $0x28] sm:$0xff] %v1091_v7  ;;  %v1095_v9 = vadd.f32 %v1094_v61, %v421_v59 }
 0x24f   :  { %1137 = vst [vmem:[#allocation8 + $0x50] sm:$0xff] %v1093_v60 }
 0x250   :  { %1138 = vst [vmem:[#allocation8 + $0x58] sm:$0xff] %v1095_v9 }
 0x252   :  { %v1098_v10 = vpop.f32.mrb[20].mxu1 }
 0x253   :  { %v1099_v11 = vadd.f32 %v1098_v10, %v417_v41  ;;  %v1100_v12 = vpop.f32.mrb[21].mxu1 }
 0x254   :  { %v1101_v23 = vadd.f32 %v1100_v12, %v421_v59  ;;  %v1102_v13 = vpop.f32.mrb[22].mxu1 }
 0x255   :  { %1143 = vst [vmem:[#allocation8 + $0x80] sm:$0xff] %v1099_v11  ;;  %v1103_v14 = vadd.f32 %v1102_v13, %v417_v41  ;;  %v1104_v57 = vpop.f32.mrb[23].mxu1 }
 0x256   :  { %1144 = vst [vmem:[#allocation8 + $0x88] sm:$0xff] %v1101_v23  ;;  %v1105_v15 = vadd.f32 %v1104_v57, %v421_v59 }
 0x257   :  { %1149 = vst [vmem:[#allocation8 + $0xb0] sm:$0xff] %v1103_v14 }
 0x258   :  { %1150 = vst [vmem:[#allocation8 + $0xb8] sm:$0xff] %v1105_v15 }
 0x25a   :  { %v1108_v16 = vpop.f32.mrb[24].mxu1 }
 0x25b   :  { %v1109_v17 = vadd.f32 %v1108_v16, %v417_v41  ;;  %v1110_v18 = vpop.f32.mrb[25].mxu1 }
 0x25c   :  { %v1111_v19 = vadd.f32 %v1110_v18, %v421_v59  ;;  %v1112_v20 = vpop.f32.mrb[26].mxu1 }
 0x25d   :  { %1155 = vst [vmem:[#allocation8 + $0xe0] sm:$0xff] %v1109_v17  ;;  %v1113_v21 = vadd.f32 %v1112_v20, %v417_v41  ;;  %v1114_v22 = vpop.f32.mrb[27].mxu1 }
 0x25e   :  { %1156 = vst [vmem:[#allocation8 + $0xe8] sm:$0xff] %v1111_v19  ;;  %v1115_v25 = vadd.f32 %v1114_v22, %v421_v59 }
 0x25f   :  { %1161 = vst [vmem:[#allocation8 + $0x110] sm:$0xff] %v1113_v21 }
 0x260   :  { %1162 = vst [vmem:[#allocation8 + $0x118] sm:$0xff] %v1115_v25 }
 0x262   :  { %v1118_v29 = vpop.f32.mrb[28].mxu1 }
 0x263   :  { %v1119_v30 = vadd.f32 %v1118_v29, %v417_v41  ;;  %v1120_v31 = vpop.f32.mrb[29].mxu1 }
 0x264   :  { %v1121_v32 = vadd.f32 %v1120_v31, %v421_v59  ;;  %v1122_v33 = vpop.f32.mrb[30].mxu1 }
 0x265   :  { %1167 = vst [vmem:[#allocation8 + $0x140] sm:$0xff] %v1119_v30  ;;  %v1123_v34 = vadd.f32 %v1122_v33, %v417_v41  ;;  %v1124_v35 = vpop.f32.mrb[31].mxu1 }
 0x266   :  { %1168 = vst [vmem:[#allocation8 + $0x148] sm:$0xff] %v1121_v32  ;;  %v1125_v36 = vadd.f32 %v1124_v35, %v421_v59 }
 0x267   :  { %1173 = vst [vmem:[#allocation8 + $0x170] sm:$0xff] %v1123_v34 }
 0x268   :  { %1174 = vst [vmem:[#allocation8 + $0x178] sm:$0xff] %v1125_v36 }
 0x269   :  { %1571 = shalt.err (!%p1568_p0)
}
 0x26a   :  { %s1572_s14 = scalar_lea.hbm %s1808_s5, 6144 }
 0x26b   :  { %p1573_p1 = scmp.ne.s32.totalorder %s1808_s5, %s1572_s14  ;;  %p1576_p2 = scmp.lt.u32.totalorder %s1572_s14, %s1808_s5 }
 0x26d   :  { %p1578_p3 = pnand %p1576_p2, %p1573_p1 }
 0x26f   :  { %1581 = shalt.err (!%p1578_p3)
}
 0x270   :  { %s1599_s18 = smov 768   ;;  %s1600_s19 = smov 48  }
 0x271   :  { %1186 = dma.vmem_to_hbm [thread:$0]  %s1181_s10, 6144, %s1808_s5, [#allocation4], %s1599_s18, %s1599_s18, %s1600_s19  }
 0x272   :  { %1586 = dma.done.wait [#allocation4], 6144  }
 0x273   :  { %1587 = vsyncadd [#allocation4], 4294961152 }
 0x274   :  { %1190 = vsyncpa [#allocation3], 1 }
 0x275   :  { %1191 = vsyncpa [#allocation6], 1 }
 0x276   :  { %1192 = vsyncpa [#allocation4], 1 }

</bundles_post_ra>
